<compile_context>
chip_gen: v7x
topology: tpu7x:2x2x1
jax: 0.10.0
libtpu: 0.0.40
codegen_flags: <defaults>
</compile_context>

<pallas_src>
import functools

import jax
import jax.numpy as jnp
from jax.experimental import pallas as pl
from jax.experimental.pallas import tpu as pltpu


def _round_up(x, m):
    return (x + m - 1) // m * m


def _a_softmax_kernel(coef_ref, tgt_ref, cos_ref, phi_ref, loss_ref,
                      m_scr, l_scr, t_scr, *,
                      gamma, num_classes, ragged):
    j = pl.program_id(1)                       # class-tile index (reduction axis)

    @pl.when(j == 0)
    def _init():
        m_scr[...] = jnp.full_like(m_scr, -jnp.inf)
        l_scr[...] = jnp.zeros_like(l_scr)
        t_scr[...] = jnp.zeros_like(t_scr)

    coef = coef_ref[0, 0]                      # runtime scalar from SMEM
    cos = cos_ref[...]                         # (bn, bc), native dtype
    phi = phi_ref[...]
    tgt = tgt_ref[...]                         # (bn, 1) int32

    bn, bc = cos.shape
    # local column index; compare against (tgt - j*bc) instead of adding j*bc
    # to the whole (bn, bc) iota (fewer VALU ops per tile).
    col = jax.lax.broadcasted_iota(jnp.int32, (bn, bc), 1)
    is_target = col == (tgt - j * bc)          # one-hot of the target class

    # output = cos, with target entry blended toward phi (in input dtype):
    #   out[i,t] = cos[i,t] + (phi[i,t] - cos[i,t]) * coef
    blended = jnp.where(is_target, cos + (phi - cos) * coef.astype(cos.dtype), cos)
    if ragged:
        # Only the ragged last class tile has out-of-range columns; the select
        # (not arithmetic) also neutralizes any garbage/NaN read past C.
        neg_inf = jnp.asarray(-jnp.inf, blended.dtype)
        blended = jnp.where(col < (num_classes - j * bc), blended, neg_inf)

    out = blended.astype(jnp.float32)          # reductions in f32

    # gather the target logit (exactly one class tile contains it per row)
    t_scr[...] = t_scr[...] + jnp.sum(
        jnp.where(is_target, out, 0.0), axis=1, keepdims=True)

    # online softmax statistics across class tiles
    m_prev = m_scr[...]
    m_new = jnp.maximum(m_prev, jnp.max(out, axis=1, keepdims=True))
    alpha = jnp.exp(m_prev - m_new)
    l_scr[...] = alpha * l_scr[...] + jnp.sum(jnp.exp(out - m_new),
                                              axis=1, keepdims=True)
    m_scr[...] = m_new

    @pl.when(j == pl.num_programs(1) - 1)
    def _finalize():
        # logpt = target_logit - max - log(sum_exp)   (no full logp array)
        logpt = t_scr[...] - m_scr[...] - jnp.log(l_scr[...])     # (bn, 1)
        if gamma == 0:
            row_loss = -logpt                                     # (1-pt)**0 == 1
        else:
            pt = jnp.exp(logpt)
            one_minus_pt = 1.0 - pt
            g = float(gamma)
            if g.is_integer() and 1.0 <= g <= 4.0:
                w = one_minus_pt
                for _ in range(int(g) - 1):                       # unrolled, no pow
                    w = w * one_minus_pt
            else:
                # clamp >= 0: fp rounding can make pt marginally > 1
                w = jnp.maximum(one_minus_pt, 0.0) ** gamma
            row_loss = -w * logpt
        loss_ref[...] = row_loss


def a_softmax_loss(cos_theta, phi_theta, target, coef, *, gamma=0,
                   block_n=None, block_c=None):
    """Gridded Pallas A-softmax loss; returns the scalar mean loss."""
    n, c = cos_theta.shape
    itemsize = jnp.dtype(cos_theta.dtype).itemsize

    # ---- batch tile (sublane multiple of 8) --------------------------------
    if block_n is None:
        if 8 < n <= 256:
            # guarantee >= 2 batch tiles so both v7x TensorCores get work
            block_n = _round_up(-(-n // 2), 8)
        else:
            block_n = min(_round_up(n, 8), 128)
    else:
        block_n = _round_up(block_n, 8)

    # ---- class tile (lane multiple of 128, or exact C for a single tile) ---
    if block_c is None:
        # ~2 MiB per input buffer (x2 inputs x2 pipeline buffers <= ~8 MiB),
        # capped at 4096 lanes; safe on v5e (16 MiB scoped) and v7x (64 MiB).
        max_bc = max(128, min(4096,
                              ((2 * 1024 * 1024) // (block_n * itemsize))
                              // 128 * 128))
        if _round_up(c, 128) <= max_bc:
            block_c = c                       # single class tile, exact dim
        else:
            block_c = max_bc
    else:
        block_c = min(_round_up(block_c, 128), _round_up(c, 128))

    grid = (pl.cdiv(n, block_n), pl.cdiv(c, block_c))
    ragged = (c % block_c) != 0               # only then emit the -inf mask

    # tiny reshapes only; the big (N, C) tensors are NOT copied/padded
    tgt = target.reshape(n, 1).astype(jnp.int32)
    coef_arr = jnp.asarray(coef, jnp.float32).reshape(1, 1)   # runtime scalar

    kernel = functools.partial(_a_softmax_kernel, gamma=gamma,
                               num_classes=c, ragged=ragged)

    per_row = pl.pallas_call(
        kernel,
        out_shape=jax.ShapeDtypeStruct((n, 1), jnp.float32),
        grid_spec=pltpu.PrefetchScalarGridSpec(
            num_scalar_prefetch=0,
            grid=grid,
            in_specs=[
                pl.BlockSpec(memory_space=pltpu.MemorySpace.SMEM),       # coef (1,1)
                pl.BlockSpec((block_n, 1), lambda i, j: (i, 0)),          # target
                pl.BlockSpec((block_n, block_c), lambda i, j: (i, j)),    # cos_theta
                pl.BlockSpec((block_n, block_c), lambda i, j: (i, j)),    # phi_theta
            ],
            out_specs=pl.BlockSpec((block_n, 1), lambda i, j: (i, 0)),
            scratch_shapes=[pltpu.VMEM((block_n, 1), jnp.float32)] * 3,   # m, l, t
        ),
        compiler_params=pltpu.CompilerParams(
            dimension_semantics=("parallel", "arbitrary"),
            vmem_limit_bytes=32 * 1024 * 1024),
    )(coef_arr, tgt, cos_theta, phi_theta)

    # Pallas only writes back the valid rows of ragged output blocks,
    # so no slicing is needed.
    return jnp.mean(per_row[:, 0])


class ASoftmax:
    """Mirrors the stateful torch A_softmax module (it counter / lambda anneal).

    The `it`-dependent lambda is folded into a runtime scalar `coef`, so the
    compiled kernel is reused across steps.
    """
    LambdaMin = 5.0
    LambdaMax = 1500.0

    def __init__(self, gamma=0):
        self.gamma = gamma
        self.it = 0
        self.lamb = 1500.0

    def __call__(self, inputs, target):
        self.it += 1
        cos_theta, phi_theta = inputs
        self.lamb = max(self.LambdaMin, self.LambdaMax / (1.0 + 0.1 * self.it))
        coef = 1.0 / (1.0 + self.lamb)
        return a_softmax_loss(cos_theta, phi_theta, target, coef,
                              gamma=self.gamma)


def _reference(cos_theta, phi_theta, target, coef, gamma):
    # pure-JAX reference of the torch forward
    one_hot = jax.nn.one_hot(target, cos_theta.shape[1], dtype=jnp.float32)
    output = cos_theta.astype(jnp.float32) + one_hot * (
        phi_theta.astype(jnp.float32) - cos_theta.astype(jnp.float32)) * coef
    logp = jax.nn.log_softmax(output, axis=1)
    logpt = jnp.sum(logp * one_hot, axis=1)
    pt = jnp.exp(logpt)
    loss = -((1.0 - pt) ** gamma) * logpt
    return jnp.mean(loss)


if __name__ == "__main__":
    key = jax.random.PRNGKey(0)
    k1, k2, k3, k4, k5, k6, k7, k8, k9 = jax.random.split(key, 9)

    # --- test 1: small shapes through the stateful module (gamma=0) ---------
    N, C = 8, 32
    cos1 = jax.random.uniform(k1, (N, C), jnp.float32, -1.0, 1.0)
    phi1 = jax.random.uniform(k2, (N, C), jnp.float32, -1.0, 1.0)
    tgt1 = jax.random.randint(k3, (N,), 0, C, dtype=jnp.int32)

    criterion = ASoftmax(gamma=0)
    loss_a = jax.block_until_ready(criterion((cos1, phi1), tgt1))   # it = 1
    coef_a = 1.0 / (1.0 + max(5.0, 1500.0 / (1.0 + 0.1 * 1)))
    ref_a = _reference(cos1, phi1, tgt1, coef_a, gamma=0)
    assert jnp.allclose(loss_a, ref_a, rtol=1e-5, atol=1e-5), (loss_a, ref_a)

    loss_b = jax.block_until_ready(criterion((cos1, phi1), tgt1))   # it = 2
    coef_b = 1.0 / (1.0 + max(5.0, 1500.0 / (1.0 + 0.1 * 2)))
    ref_b = _reference(cos1, phi1, tgt1, coef_b, gamma=0)
    assert jnp.allclose(loss_b, ref_b, rtol=1e-5, atol=1e-5), (loss_b, ref_b)

    # --- test 2: ragged rows AND ragged class tiles, no padding, gamma=2 ----
    N2, C2 = 12, 200        # grid (2, 2): last row tile and last class tile ragged
    cos2 = jax.random.uniform(k4, (N2, C2), jnp.float32, -1.0, 1.0)
    phi2 = jax.random.uniform(k5, (N2, C2), jnp.float32, -1.0, 1.0)
    tgt2 = jax.random.randint(k6, (N2,), 0, C2, dtype=jnp.int32)
    coef2 = 1.0 / (1.0 + max(5.0, 1500.0 / (1.0 + 0.1 * 3)))

    loss2 = jax.block_until_ready(
        a_softmax_loss(cos2, phi2, tgt2, coef2, gamma=2, block_n=8, block_c=128))
    ref2 = _reference(cos2, phi2, tgt2, coef2, gamma=2)
    assert jnp.allclose(loss2, ref2, rtol=1e-5, atol=1e-5), (loss2, ref2)

    # --- test 3: bf16 inputs, default tiling (>=2 batch tiles), gamma=0 -----
    N3, C3 = 16, 200
    cos3 = jax.random.uniform(k7, (N3, C3), jnp.float32, -1.0, 1.0).astype(jnp.bfloat16)
    phi3 = jax.random.uniform(k8, (N3, C3), jnp.float32, -1.0, 1.0).astype(jnp.bfloat16)
    tgt3 = jax.random.randint(k9, (N3,), 0, C3, dtype=jnp.int32)
    coef3 = 1.0 / (1.0 + max(5.0, 1500.0 / (1.0 + 0.1 * 5)))

    loss3 = jax.block_until_ready(a_softmax_loss(cos3, phi3, tgt3, coef3, gamma=0))
    ref3 = _reference(cos3, phi3, tgt3, coef3, gamma=0)
    # bf16 in-dtype blend vs f32 reference blend -> looser tolerance
    assert jnp.allclose(loss3, ref3, rtol=5e-2, atol=5e-2), (loss3, ref3)

    print("KERNEL_OK")
</pallas_src>

<mosaic_0001>
module attributes {stable_mosaic.version = 11 : i64} {
  func.func @_a_softmax_kernel(%arg0: i32, %arg1: i32, %arg2: memref<1x1xf32, #tpu.memory_space<smem>>, %arg3: memref<8x1xi32, #tpu.memory_space<vmem>>, %arg4: memref<8x32xf32, #tpu.memory_space<vmem>>, %arg5: memref<8x32xf32, #tpu.memory_space<vmem>>, %arg6: memref<8x1xf32, #tpu.memory_space<vmem>>, %arg7: memref<8x1xf32, #tpu.memory_space<vmem>>, %arg8: memref<8x1xf32, #tpu.memory_space<vmem>>, %arg9: memref<8x1xf32, #tpu.memory_space<vmem>>) attributes {dimension_semantics = [#tpu.dimension_semantics<parallel>, #tpu.dimension_semantics<arbitrary>], iteration_bounds = array<i64: 1, 1>, scalar_prefetch = 0 : i64, scratch_operands = 3 : i64, tpu.core_type = #tpu.core_type<tc>, window_params = [{transform_indices = @transform_0, window_bounds = array<i64: 1, 1>}, {transform_indices = @transform_1, window_bounds = array<i64: 8, 1>}, {transform_indices = @transform_2, window_bounds = array<i64: 8, 32>}, {transform_indices = @transform_3, window_bounds = array<i64: 8, 32>}, {transform_indices = @transform_4, window_bounds = array<i64: 8, 1>}]} {
    %c0_i32 = arith.constant 0 : i32
    %0 = arith.cmpi eq, %arg1, %c0_i32 : i32
    %1 = arith.extui %0 : i1 to i32
    %c0_i32_0 = arith.constant 0 : i32
    %2 = arith.cmpi ne, %1, %c0_i32_0 : i32
    scf.if %2 {
      %cst_25 = arith.constant 0xFF800000 : f32
      %44 = vector.broadcast %cst_25 : f32 to vector<8x1xf32>
      %c0_26 = arith.constant 0 : index
      %c0_27 = arith.constant 0 : index
      %45 = vector.load %arg7[%c0_26, %c0_27] : memref<8x1xf32, #tpu.memory_space<vmem>>, vector<8x1xf32>
      tpu.vector_store %arg7[%c0_26, %c0_27], %44 {strides = array<i32>} : memref<8x1xf32, #tpu.memory_space<vmem>>, vector<8x1xf32>,
      %cst_28 = arith.constant 0.000000e+00 : f32
      %46 = vector.broadcast %cst_28 : f32 to vector<8x1xf32>
      %c0_29 = arith.constant 0 : index
      %c0_30 = arith.constant 0 : index
      %47 = vector.load %arg8[%c0_29, %c0_30] : memref<8x1xf32, #tpu.memory_space<vmem>>, vector<8x1xf32>
      tpu.vector_store %arg8[%c0_29, %c0_30], %46 {strides = array<i32>} : memref<8x1xf32, #tpu.memory_space<vmem>>, vector<8x1xf32>,
      %cst_31 = arith.constant 0.000000e+00 : f32
      %48 = vector.broadcast %cst_31 : f32 to vector<8x1xf32>
      %c0_32 = arith.constant 0 : index
      %c0_33 = arith.constant 0 : index
      %49 = vector.load %arg9[%c0_32, %c0_33] : memref<8x1xf32, #tpu.memory_space<vmem>>, vector<8x1xf32>
      tpu.vector_store %arg9[%c0_32, %c0_33], %48 {strides = array<i32>} : memref<8x1xf32, #tpu.memory_space<vmem>>, vector<8x1xf32>,
    } else {
    }
    %c0 = arith.constant 0 : index
    %c0_1 = arith.constant 0 : index
    %3 = memref.load %arg2[%c0, %c0_1] : memref<1x1xf32, #tpu.memory_space<smem>>
    %c0_2 = arith.constant 0 : index
    %c0_3 = arith.constant 0 : index
    %4 = vector.load %arg4[%c0_2, %c0_3] : memref<8x32xf32, #tpu.memory_space<vmem>>, vector<8x32xf32>
    %c0_4 = arith.constant 0 : index
    %c0_5 = arith.constant 0 : index
    %5 = vector.load %arg5[%c0_4, %c0_5] : memref<8x32xf32, #tpu.memory_space<vmem>>, vector<8x32xf32>
    %c0_6 = arith.constant 0 : index
    %c0_7 = arith.constant 0 : index
    %6 = vector.load %arg3[%c0_6, %c0_7] : memref<8x1xi32, #tpu.memory_space<vmem>>, vector<8x1xi32>
    %7 = tpu.iota {dimensions = array<i32: 1>} : vector<8x32xi32>
    %c32_i32 = arith.constant 32 : i32
    %8 = arith.muli %arg1, %c32_i32 : i32
    %9 = vector.broadcast %8 : i32 to vector<8x1xi32>
    %10 = arith.subi %6, %9 : vector<8x1xi32>
    %11 = vector.broadcast %10 : vector<8x1xi32> to vector<8x32xi32>
    %12 = arith.cmpi eq, %7, %11 : vector<8x32xi32>
    %13 = arith.subf %5, %4 : vector<8x32xf32>
    %14 = vector.broadcast %3 : f32 to vector<8x32xf32>
    %15 = arith.mulf %13, %14 : vector<8x32xf32>
    %16 = arith.addf %4, %15 : vector<8x32xf32>
    %17 = arith.select %12, %16, %4 : vector<8x32xi1>, vector<8x32xf32>
    %c0_8 = arith.constant 0 : index
    %c0_9 = arith.constant 0 : index
    %18 = vector.load %arg9[%c0_8, %c0_9] : memref<8x1xf32, #tpu.memory_space<vmem>>, vector<8x1xf32>
    %cst = arith.constant 0.000000e+00 : f32
    %19 = vector.broadcast %cst : f32 to vector<8x32xf32>
    %20 = arith.select %12, %17, %19 : vector<8x32xi1>, vector<8x32xf32>
    %cst_10 = arith.constant dense<0.000000e+00> : vector<8xf32>
    %21 = vector.multi_reduction <add>, %20, %cst_10 [1] : vector<8x32xf32> to vector<8xf32>
    %22 = vector.shape_cast %21 : vector<8xf32> to vector<8x1xf32>
    %23 = arith.addf %18, %22 : vector<8x1xf32>
    %c0_11 = arith.constant 0 : index
    %c0_12 = arith.constant 0 : index
    %24 = vector.load %arg9[%c0_11, %c0_12] : memref<8x1xf32, #tpu.memory_space<vmem>>, vector<8x1xf32>
    tpu.vector_store %arg9[%c0_11, %c0_12], %23 {strides = array<i32>} : memref<8x1xf32, #tpu.memory_space<vmem>>, vector<8x1xf32>,
    %c0_13 = arith.constant 0 : index
    %c0_14 = arith.constant 0 : index
    %25 = vector.load %arg7[%c0_13, %c0_14] : memref<8x1xf32, #tpu.memory_space<vmem>>, vector<8x1xf32>
    %cst_15 = arith.constant dense<0xFF800000> : vector<8xf32>
    %26 = vector.multi_reduction <maximumf>, %17, %cst_15 [1] : vector<8x32xf32> to vector<8xf32>
    %27 = vector.shape_cast %26 : vector<8xf32> to vector<8x1xf32>
    %28 = arith.maximumf %25, %27 : vector<8x1xf32>
    %29 = arith.subf %25, %28 : vector<8x1xf32>
    %30 = math.exp %29 : vector<8x1xf32>
    %c0_16 = arith.constant 0 : index
    %c0_17 = arith.constant 0 : index
    %31 = vector.load %arg8[%c0_16, %c0_17] : memref<8x1xf32, #tpu.memory_space<vmem>>, vector<8x1xf32>
    %32 = arith.mulf %30, %31 : vector<8x1xf32>
    %33 = vector.broadcast %28 : vector<8x1xf32> to vector<8x32xf32>
    %34 = arith.subf %17, %33 : vector<8x32xf32>
    %35 = math.exp %34 : vector<8x32xf32>
    %cst_18 = arith.constant dense<0.000000e+00> : vector<8xf32>
    %36 = vector.multi_reduction <add>, %35, %cst_18 [1] : vector<8x32xf32> to vector<8xf32>
    %37 = vector.shape_cast %36 : vector<8xf32> to vector<8x1xf32>
    %38 = arith.addf %32, %37 : vector<8x1xf32>
    %c0_19 = arith.constant 0 : index
    %c0_20 = arith.constant 0 : index
    %39 = vector.load %arg8[%c0_19, %c0_20] : memref<8x1xf32, #tpu.memory_space<vmem>>, vector<8x1xf32>
    tpu.vector_store %arg8[%c0_19, %c0_20], %38 {strides = array<i32>} : memref<8x1xf32, #tpu.memory_space<vmem>>, vector<8x1xf32>,
    %c0_21 = arith.constant 0 : index
    %c0_22 = arith.constant 0 : index
    %40 = vector.load %arg7[%c0_21, %c0_22] : memref<8x1xf32, #tpu.memory_space<vmem>>, vector<8x1xf32>
    tpu.vector_store %arg7[%c0_21, %c0_22], %28 {strides = array<i32>} : memref<8x1xf32, #tpu.memory_space<vmem>>, vector<8x1xf32>,
    %c0_i32_23 = arith.constant 0 : i32
    %41 = arith.cmpi eq, %arg1, %c0_i32_23 : i32
    %42 = arith.extui %41 : i1 to i32
    %c0_i32_24 = arith.constant 0 : i32
    %43 = arith.cmpi ne, %42, %c0_i32_24 : i32
    scf.if %43 {
      %c0_25 = arith.constant 0 : index
      %c0_26 = arith.constant 0 : index
      %44 = vector.load %arg9[%c0_25, %c0_26] : memref<8x1xf32, #tpu.memory_space<vmem>>, vector<8x1xf32>
      %c0_27 = arith.constant 0 : index
      %c0_28 = arith.constant 0 : index
      %45 = vector.load %arg7[%c0_27, %c0_28] : memref<8x1xf32, #tpu.memory_space<vmem>>, vector<8x1xf32>
      %46 = arith.subf %44, %45 : vector<8x1xf32>
      %c0_29 = arith.constant 0 : index
      %c0_30 = arith.constant 0 : index
      %47 = vector.load %arg8[%c0_29, %c0_30] : memref<8x1xf32, #tpu.memory_space<vmem>>, vector<8x1xf32>
      %48 = math.log %47 : vector<8x1xf32>
      %49 = arith.subf %46, %48 : vector<8x1xf32>
      %cst_31 = arith.constant 0.000000e+00 : f32
      %50 = vector.broadcast %cst_31 : f32 to vector<8x1xf32>
      %51 = arith.subf %50, %49 : vector<8x1xf32>
      %c0_32 = arith.constant 0 : index
      %c0_33 = arith.constant 0 : index
      %52 = vector.load %arg6[%c0_32, %c0_33] : memref<8x1xf32, #tpu.memory_space<vmem>>, vector<8x1xf32>
      tpu.vector_store %arg6[%c0_32, %c0_33], %51 {strides = array<i32>} : memref<8x1xf32, #tpu.memory_space<vmem>>, vector<8x1xf32>,
    } else {
    }
    return
  }
  func.func @transform_0(%arg0: i32, %arg1: i32) -> (i32, i32) {
    %c0_i32 = arith.constant 0 : i32
    %c0_i32_0 = arith.constant 0 : i32
    %c0_i32_1 = arith.constant 0 : i32
    return %c0_i32, %c0_i32_0 : i32, i32
  }
  func.func @transform_1(%arg0: i32, %arg1: i32) -> (i32, i32) {
    %c0_i32 = arith.constant 0 : i32
    %c0_i32_0 = arith.constant 0 : i32
    return %arg0, %c0_i32 : i32, i32
  }
  func.func @transform_2(%arg0: i32, %arg1: i32) -> (i32, i32) {
    %c0_i32 = arith.constant 0 : i32
    return %arg0, %arg1 : i32, i32
  }
  func.func @transform_3(%arg0: i32, %arg1: i32) -> (i32, i32) {
    %c0_i32 = arith.constant 0 : i32
    return %arg0, %arg1 : i32, i32
  }
  func.func @transform_4(%arg0: i32, %arg1: i32) -> (i32, i32) {
    %c0_i32 = arith.constant 0 : i32
    %c0_i32_0 = arith.constant 0 : i32
    return %arg0, %c0_i32 : i32, i32
  }
}

</mosaic_0001>

<bundles_post_ra>
// kernel: tpu_custom_call.1
= control target key start
LH: loop header
LB: loop body
LE: loop exit
PB: predicated region body
PF: predicated region fallthrough
CT: control target
= control target key end

     0   :  { %v104_v0 = vmov 0   ;;  %vm22_vm0 = vcmask 7168   ;;  %v105_v2 = vmov -inf   ;;  %v30_v7 = vlaneseq  ;;  %s157_s1 = inlined_call_operand.vmem [shape: s32[8,1], index: 1, kind: input, shape index: {}]   ;;  %s158_s2 = inlined_call_operand.vmem [shape: f32[8,32], index: 2, kind: input, shape index: {}]   ;;  %s159_s3 = inlined_call_operand.vmem [shape: f32[8,32], index: 3, kind: input, shape index: {}]   ;;  %s160_s0 = inlined_call_operand.<no memory space> [shape: f32[1,1], index: 0, kind: input, shape index: {}]   ;;  %s161_s4 = inlined_call_operand.vmem [shape: f32[8,1], index: 4, kind: output, shape index: {}]  }
   0x1   :  { %96 = vset.pattern.permute.xlu0 %v104_v0  ;;  %v29_v1 = vld [vmem:[%s157_s1] sm:$0xff]  ;;  %97 = vset.pattern.permute.xlu1 %v104_v0  ;;  %23 = vst.msk [vmem:[#allocation2] sm:$0xff] %vm22_vm0, %v105_v2  ;;  %v40_v6 = vstv %s160_s0  ;;  %vm46_vm1 = vcmask 261120   ;;  %v106_v16 = vmov 0.0  }
   0x2   :  { %36 = vperm.xlu0 %96, %v29_v1   ;;  %v27_v3 = vld [vmem:[%s158_s2] sm:$0xff]  ;;  %v31_v9 = vand.u32 127, %v30_v7  ;;  %25 = vst.msk [vmem:[#allocation4] sm:$0xff] %vm22_vm0, %v106_v16  ;;  %24 = vst.msk [vmem:[#allocation3] sm:$0xff] %vm22_vm0, %v106_v16 }
   0x3   :  { %v28_v4 = vld [vmem:[%s159_s3] sm:$0xff] }
   0x4   :  { %v39_v5 = vsub.f32 %v28_v4, %v27_v3 }
   0x6   :  { %v41_v8 = vmul.f32 %v40_v6, %v39_v5 }
   0x8   :  { %v42_v10 = vadd.f32 %v41_v8, %v27_v3  ;;  %v53_v17 = vld [vmem:[#allocation2] sm:$0xff] }
   0x9   :  { %v44_v20 = vld [vmem:[#allocation4] sm:$0xff]  ;;  %v61_v31 = vld [vmem:[#allocation3] sm:$0xff] }
  0x81   :  { %v37_v11 = vpop.permute.xlu0 %36 }
  0x82   :  { %vm38_vm2 = vcmp.eq.s32.totalorder %v31_v9, %v37_v11 }
  0x83   :  { %v43_v12 = vsel %vm38_vm2, %v42_v10, %v27_v3  ;;  %v45_v14 = vsel %vm38_vm2, %v42_v10, 0.0 }
  0x84   :  { %v54_v13 = vsel %vm46_vm1, %v43_v12, -inf  ;;  %v47_v15 = vsel %vm46_vm1, %v45_v14, 0.0 }
  0x85   :  { %55 = vmax.xlane.f32.xlu0 %v54_v13 }
  0x89   :  { %48 = vadd.xlane.f32.xlu0 %v47_v15 }
 0x112   :  { %v56_v18 = vpop.xlane.xlu0 %55 }
 0x113   :  { %v57_v19 = vmax.f32 %v53_v17, %v56_v18 }
 0x115   :  { %v58_v21 = vsub.f32 %v53_v17, %v57_v19  ;;  %76 = vst.msk [vmem:[#allocation2] sm:$0xff] %vm22_vm0, %v57_v19  ;;  %65 = vperm.xlu1 %97, %v57_v19  }
 0x116   :  { %v49_v22 = vpop.xlane.xlu0 %48 }
 0x117   :  { %v50_v23 = vadd.f32 %v49_v22, %v44_v20  ;;  %v59_v29 = vmul.f32 1.442695, %v58_v21 }
 0x119   :  { %52 = vst.msk [vmem:[#allocation4] sm:$0xff] %vm22_vm0, %v50_v23 }
 0x11c   :  { %v81_v38 = vld [vmem:[#allocation2] sm:$0xff] }
 0x120   :  { %v80_v36 = vld [vmem:[#allocation4] sm:$0xff] }
 0x121   :  { %v82_v39 = vsub.f32 %v80_v36, %v81_v38 }
 0x194   :  { %v66_v24 = vpop.permute.xlu1 %65 }
 0x195   :  { %v68_v25 = vsub.f32 %v43_v12, %v66_v24 }
 0x197   :  { %v69_v26 = vmul.f32 1.442695, %v68_v25 }
 0x199   :  { %98 = vpow2.f32 %v69_v26 }
 0x19a   :  { %100 = vpow2.f32 %v59_v29 }
 0x1a3   :  { %v99_v27 = vpop.eup %98 }
 0x1a4   :  { %v71_v28 = vsel %vm46_vm1, %v99_v27, 0.0  ;;  %v101_v30 = vpop.eup %100 }
 0x1a5   :  { %72 = vadd.xlane.f32.xlu1 %v71_v28  ;;  %v62_v32 = vmul.f32 %v101_v30, %v61_v31 }
 0x232   :  { %v73_v33 = vpop.xlane.xlu1 %72 }
 0x233   :  { %v74_v34 = vadd.f32 %v73_v33, %v62_v32 }
 0x235   :  { %75 = vst.msk [vmem:[#allocation3] sm:$0xff] %vm22_vm0, %v74_v34 }
 0x23c   :  { %v83_v35 = vld [vmem:[#allocation3] sm:$0xff] }
 0x23d   :  { %102 = vlog2.f32 %v83_v35 }
 0x247   :  { %v103_v37 = vpop.eup %102 }
 0x248   :  { %v85_v40 = vmul.f32 0.6931472, %v103_v37 }
 0x24a   :  { %v86_v41 = vsub.f32 %v82_v39, %v85_v40 }
 0x24c   :  { %v87_v42 = vsub.f32 0.0, %v86_v41 }
 0x24e   :  { %88 = vst.msk [vmem:[%s161_s4] sm:$0xff] %vm22_vm0, %v87_v42 }

</bundles_post_ra>
